<compile_context>
chip_gen: v6e
topology: v6e:2x2x1
jax: 0.10.0
libtpu: 0.0.40
codegen_flags: <defaults>
</compile_context>

<pallas_src>
import functools

import jax
import jax.numpy as jnp
from jax.experimental import pallas as pl
from jax.experimental.pallas import tpu as pltpu

_MIB = 1024 * 1024


def _round_up(x, m):
    return ((x + m - 1) // m) * m


def _detect_tpu():
    """Best-effort (vmem_capacity_bytes, tensorcores_per_chip) for this host."""
    vmem = None
    try:
        vmem = int(pltpu.get_tpu_info().vmem_capacity_bytes)
    except Exception:
        vmem = None
    n_tc = 1
    try:
        kind = jax.devices()[0].device_kind.lower()
        if "v7" in kind or "7x" in kind:
            n_tc = 2                          # v7x-class parts have 2 TCs/chip
    except Exception:
        pass
    if vmem is not None and vmem <= 64 * _MIB:
        n_tc = max(n_tc, 2)                   # 64 MiB/core VMEM => v7x-class
    if vmem is None:
        vmem = 64 * _MIB                      # conservative fallback
    return vmem, n_tc


def _spec(block_shape, index_map, buffer_count=None):
    """BlockSpec with an optional pipeline depth (graceful API fallback)."""
    if buffer_count is None:
        return pl.BlockSpec(block_shape, index_map)
    try:
        return pl.BlockSpec(block_shape, index_map,
                            pipeline_mode=pl.Buffered(int(buffer_count)))
    except Exception:                         # older jax: no pipeline_mode kwarg
        return pl.BlockSpec(block_shape, index_map)


def _hint_loss_kernel(fs_ref, ft_ref, wt_ref, b_ref, out_ref, *, cast_dtype):
    """One (batch_tile x tile_n) step of sum((f_s - (f_t @ W^T + b))**2).

    Grid = (n_par, n_n, n_steps): core-parallel slices, s-dim tiles, batch
    reduction (innermost, 'arbitrary').  out_ref is the resident (1, 1, tile_n)
    f32 partial-sum block for this (core-slice, s-tile); it is revisited across
    the batch axis and written back to HBM once.
    """
    j = pl.program_id(2)

    @pl.when(j == 0)
    def _():
        out_ref[...] = jnp.zeros_like(out_ref)

    ft = ft_ref[...]
    if cast_dtype is not None and ft.dtype != cast_dtype:
        ft = ft.astype(cast_dtype)            # bf16 MXU path; cast in-kernel

    # MXU matmul with f32 accumulation; W^T arrives pre-transposed & pre-cast,
    # so there is no in-kernel transpose.
    y = jnp.dot(ft, wt_ref[...], preferred_element_type=jnp.float32)
    d = fs_ref[...].astype(jnp.float32) - y - b_ref[...].astype(jnp.float32)

    # Fold the whole batch tile into one row per step (sublane reduce -> XLU
    # slot, which has slack); per-step store traffic is only tile_n/128 vregs.
    psum = jnp.sum(d * d, axis=0, keepdims=True)        # (1, tile_n) f32
    out_ref[...] += psum[None]                          # (1, 1, tile_n)


def hint_loss(f_s, f_t, weight, bias, *, matmul_dtype=jnp.bfloat16,
              batch_tile=None, tile_n=None, num_parallel_cores=None,
              stream_buffer_count=None):
    """mean((f_s - (f_t @ weight.T + bias))**2) via a Pallas TPU kernel.

    matmul_dtype: dtype fed to the MXU (default bf16, f32 accumulation).  Use
      jnp.float32 (or None to keep the input dtype) for bit-accurate matmuls.
    batch_tile / tile_n: optional overrides of the auto VMEM-fit plan.
    num_parallel_cores: leading 'parallel' grid axis; auto = 2 on v7x, 1 else.
    stream_buffer_count: optional pipeline depth for the streamed f_s/f_t
      (e.g. 3 on 128-MiB parts if profiling shows exposed DMA).
    """
    B, s_shape = f_s.shape
    B2, t_shape = f_t.shape
    assert B == B2
    assert weight.shape == (s_shape, t_shape)
    assert bias.shape == (s_shape,)

    if matmul_dtype is not None:
        matmul_dtype = jnp.dtype(matmul_dtype)

    # ---- generation-aware VMEM / core plan -------------------------------
    vmem_cap, n_tc = _detect_tpu()
    vmem_limit = int(min(vmem_cap - 8 * _MIB, 100 * _MIB))   # headroom for Mosaic
    vmem_limit = max(vmem_limit, 16 * _MIB)
    budget = int(0.75 * vmem_limit)

    # ---- lane-dense feature padding (zero columns are neutral) -----------
    T_pad = _round_up(t_shape, 128)
    S_pad0 = _round_up(s_shape, 128)

    # Transpose (and cast) W once; the kernel never transposes.
    w_dtype = matmul_dtype if matmul_dtype is not None else weight.dtype
    w_t = jnp.transpose(weight).astype(w_dtype)               # (t, s)

    fs_itemsize = f_s.dtype.itemsize
    ft_itemsize = f_t.dtype.itemsize
    wt_itemsize = jnp.dtype(w_dtype).itemsize
    s_bufs = 2 if stream_buffer_count is None else int(stream_buffer_count)
    w_bufs = 1     # resident W^T / bias: constant block index over reduction

    # ---- pick batch_tile / tile_n so everything fits the VMEM budget -----
    big_vmem = vmem_cap >= 96 * _MIB
    bt_cap = 512 if big_vmem else 256
    if batch_tile is None:
        batch_tile = min(bt_cap, _round_up(B, 16))
    batch_tile = max(16, _round_up(int(batch_tile), 16))      # bf16 sublane pack

    def vmem_use(bt, tn):
        return (s_bufs * bt * tn * fs_itemsize                # f_s tiles
                + s_bufs * bt * T_pad * ft_itemsize           # f_t tiles
                + w_bufs * T_pad * tn * wt_itemsize           # resident W^T panel
                + w_bufs * 8 * tn * 4                         # bias row (padded)
                + 2 * 8 * tn * 4)                             # output partials

    if tile_n is None:
        tile_n = S_pad0
        while tile_n > 128 and vmem_use(batch_tile, tile_n) > budget:
            tile_n = max(128, _round_up(tile_n // 2, 128))
    tile_n = max(128, _round_up(int(tile_n), 128))
    while batch_tile > 16 and vmem_use(batch_tile, tile_n) > budget:
        batch_tile = max(16, _round_up(batch_tile // 2, 16))
    # NOTE: for extremely large t_shape a K (t_shape) reduction axis could be
    # added as well; not needed for typical hint-loss regressor sizes.

    S_pad = _round_up(S_pad0, tile_n)
    n_n = S_pad // tile_n

    # ---- pad operands (zeros => mathematically neutral columns) ----------
    if S_pad != s_shape:
        f_s = jnp.pad(f_s, ((0, 0), (0, S_pad - s_shape)))
    if T_pad != t_shape:
        f_t = jnp.pad(f_t, ((0, 0), (0, T_pad - t_shape)))
    w_t = jnp.pad(w_t, ((0, T_pad - t_shape), (0, S_pad - s_shape)))
    bias_row = jnp.pad(bias.astype(jnp.float32),
                       (0, S_pad - s_shape)).reshape(1, S_pad)

    # ---- batch tiling / core-parallel slices ------------------------------
    n_tiles = pl.cdiv(B, batch_tile)
    if num_parallel_cores is None:
        num_parallel_cores = n_tc
    n_par = max(1, min(int(num_parallel_cores), n_tiles))
    n_steps = pl.cdiv(n_tiles, n_par)
    b_pad = n_par * n_steps * batch_tile
    if b_pad != B:
        # Zero-padded rows contribute exactly sum(bias**2) each; corrected
        # analytically below (no per-step masking in the kernel).
        f_s = jnp.pad(f_s, ((0, b_pad - B), (0, 0)))
        f_t = jnp.pad(f_t, ((0, b_pad - B), (0, 0)))

    in_specs = [
        # f_s tile (streamed)
        _spec((batch_tile, tile_n), lambda p, n, j: (p * n_steps + j, n),
              stream_buffer_count),
        # f_t tile (streamed)
        _spec((batch_tile, T_pad), lambda p, n, j: (p * n_steps + j, 0),
              stream_buffer_count),
        # W^T panel: resident across the reduction axis, single-buffered
        _spec((T_pad, tile_n), lambda p, n, j: (0, n), w_bufs),
        # bias row: resident, single-buffered
        _spec((1, tile_n), lambda p, n, j: (0, n), w_bufs),
    ]
    out_spec = pl.BlockSpec((1, 1, tile_n), lambda p, n, j: (p, 0, n))

    cost = pl.CostEstimate(
        flops=int(2 * b_pad * S_pad * T_pad + 4 * b_pad * S_pad),
        transcendentals=0,
        bytes_accessed=int(b_pad * S_pad * fs_itemsize
                           + b_pad * T_pad * ft_itemsize
                           + n_par * T_pad * S_pad * wt_itemsize
                           + n_par * S_pad * 4),
    )

    kernel = functools.partial(_hint_loss_kernel, cast_dtype=matmul_dtype)

    partials = pl.pallas_call(
        kernel,
        out_shape=jax.ShapeDtypeStruct((n_par, 1, S_pad), jnp.float32),
        grid_spec=pltpu.PrefetchScalarGridSpec(
            num_scalar_prefetch=0,
            grid=(n_par, n_n, n_steps),
            in_specs=in_specs,
            out_specs=out_spec,
        ),
        compiler_params=pltpu.CompilerParams(
            dimension_semantics=("parallel", "parallel", "arbitrary"),
            vmem_limit_bytes=vmem_limit,
        ),
        cost_estimate=cost,
    )(f_s, f_t, w_t, bias_row)

    # Tiny epilogue: scalar sum of the per-(core, s-tile) partials, analytic
    # padded-row correction, and the mean's divide.
    total = jnp.sum(partials)
    pad_rows = b_pad - B
    if pad_rows:
        total = total - jnp.float32(pad_rows) * jnp.sum(
            bias.astype(jnp.float32) ** 2)
    return total / jnp.float32(B * s_shape)


if __name__ == "__main__":
    # Shapes consistent with the module: batch=16, t_shape=64, s_shape=32.
    B, t_shape, s_shape = 16, 64, 32

    key = jax.random.PRNGKey(0)
    k_fs, k_ft, k_w, k_b = jax.random.split(key, 4)

    f_s = jax.random.normal(k_fs, (B, s_shape), dtype=jnp.float32)
    f_t = jax.random.normal(k_ft, (B, t_shape), dtype=jnp.float32)

    # Deterministic Linear init (PyTorch-style uniform bound 1/sqrt(fan_in)).
    bound = 1.0 / (t_shape ** 0.5)
    weight = jax.random.uniform(k_w, (s_shape, t_shape), jnp.float32, -bound, bound)
    bias = jax.random.uniform(k_b, (s_shape,), jnp.float32, -bound, bound)

    ref_f32 = jnp.mean((f_s - (f_t @ weight.T + bias)) ** 2)

    # 1) f32 MXU path: tight agreement with the f32 reference.
    loss_f32 = jax.jit(functools.partial(hint_loss, matmul_dtype=jnp.float32))(
        f_s, f_t, weight, bias)
    loss_f32 = jax.block_until_ready(loss_f32)
    assert jnp.allclose(loss_f32, ref_f32, rtol=1e-5, atol=1e-6), (loss_f32, ref_f32)

    # 2) default bf16 MXU path: matches a bf16-matmul reference tightly and the
    #    f32 reference loosely.
    loss_bf16 = jax.jit(hint_loss)(f_s, f_t, weight, bias)
    loss_bf16 = jax.block_until_ready(loss_bf16)
    y_bf = jnp.dot(f_t.astype(jnp.bfloat16), weight.T.astype(jnp.bfloat16),
                   preferred_element_type=jnp.float32) + bias
    ref_bf16 = jnp.mean((f_s - y_bf) ** 2)
    assert jnp.allclose(loss_bf16, ref_bf16, rtol=1e-3, atol=1e-5), (loss_bf16, ref_bf16)
    assert jnp.allclose(loss_bf16, ref_f32, rtol=5e-2, atol=5e-3), (loss_bf16, ref_f32)

    # 3) Ragged batch + non-128 feature dims + forced s-dim tiling: exercises
    #    the zero-padding, the analytic padded-row correction, multi-step
    #    batch reduction and the tile_n grid axis.
    B3, t3, s3 = 37, 200, 160
    k1, k2, k3, k4 = jax.random.split(jax.random.PRNGKey(1), 4)
    f_s3 = jax.random.normal(k1, (B3, s3), dtype=jnp.float32)
    f_t3 = jax.random.normal(k2, (B3, t3), dtype=jnp.float32)
    bound3 = 1.0 / (t3 ** 0.5)
    w3 = jax.random.uniform(k3, (s3, t3), jnp.float32, -bound3, bound3)
    b3 = jax.random.uniform(k4, (s3,), jnp.float32, -bound3, bound3)
    ref3 = jnp.mean((f_s3 - (f_t3 @ w3.T + b3)) ** 2)
    loss3 = jax.jit(functools.partial(hint_loss, matmul_dtype=jnp.float32,
                                      batch_tile=16, tile_n=128))(
        f_s3, f_t3, w3, b3)
    loss3 = jax.block_until_ready(loss3)
    assert jnp.allclose(loss3, ref3, rtol=1e-4, atol=1e-6), (loss3, ref3)

    print("KERNEL_OK")
</pallas_src>

<mosaic_0001>
module attributes {stable_mosaic.version = 11 : i64} {
  func.func @_hint_loss_kernel(%arg0: i32, %arg1: i32, %arg2: i32, %arg3: memref<16x128xf32, #tpu.memory_space<vmem>>, %arg4: memref<16x128xf32, #tpu.memory_space<vmem>>, %arg5: memref<128x128xf32, #tpu.memory_space<vmem>>, %arg6: memref<1x128xf32, #tpu.memory_space<vmem>>, %arg7: memref<1x1x128xf32, #tpu.memory_space<vmem>>) attributes {dimension_semantics = [#tpu.dimension_semantics<parallel>, #tpu.dimension_semantics<parallel>, #tpu.dimension_semantics<arbitrary>], iteration_bounds = array<i64: 1, 1, 1>, scalar_prefetch = 0 : i64, scratch_operands = 0 : i64, tpu.core_type = #tpu.core_type<tc>, window_params = [{transform_indices = @transform_0, window_bounds = array<i64: 16, 128>}, {transform_indices = @transform_1, window_bounds = array<i64: 16, 128>}, {pipeline_mode = #tpu.pipeline_mode<synchronous>, transform_indices = @transform_2, window_bounds = array<i64: 128, 128>}, {pipeline_mode = #tpu.pipeline_mode<synchronous>, transform_indices = @transform_3, window_bounds = array<i64: 1, 128>}, {transform_indices = @transform_4, window_bounds = array<i64: 1, 1, 128>}]} {
    %c0_i32 = arith.constant 0 : i32
    %0 = arith.cmpi eq, %arg2, %c0_i32 : i32
    %1 = arith.extui %0 : i1 to i32
    %c0_i32_0 = arith.constant 0 : i32
    %2 = arith.cmpi ne, %1, %c0_i32_0 : i32
    scf.if %2 {
      %cst_15 = arith.constant 0.000000e+00 : f32
      %18 = vector.broadcast %cst_15 : f32 to vector<1x1x128xf32>
      %c0_16 = arith.constant 0 : index
      %c0_17 = arith.constant 0 : index
      %c0_18 = arith.constant 0 : index
      %19 = vector.load %arg7[%c0_16, %c0_17, %c0_18] : memref<1x1x128xf32, #tpu.memory_space<vmem>>, vector<1x1x128xf32>
      tpu.vector_store %arg7[%c0_16, %c0_17, %c0_18], %18 {strides = array<i32>} : memref<1x1x128xf32, #tpu.memory_space<vmem>>, vector<1x1x128xf32>,
    } else {
    }
    %c0 = arith.constant 0 : index
    %c0_1 = arith.constant 0 : index
    %3 = vector.load %arg4[%c0, %c0_1] : memref<16x128xf32, #tpu.memory_space<vmem>>, vector<16x128xf32>
    %c0_2 = arith.constant 0 : index
    %c0_3 = arith.constant 0 : index
    %4 = vector.load %arg5[%c0_2, %c0_3] : memref<128x128xf32, #tpu.memory_space<vmem>>, vector<128x128xf32>
    %cst = arith.constant dense<0.000000e+00> : vector<16x128xf32>
    %5 = tpu.matmul %3, %4, %cst {dimension_numbers = #tpu.dot_dimension_numbers<[1], [0], [0], [1], [0, 0, 1, 1], [], []>} : vector<16x128xf32>, vector<128x128xf32>, vector<16x128xf32> -> vector<16x128xf32>
    %c0_4 = arith.constant 0 : index
    %c0_5 = arith.constant 0 : index
    %6 = vector.load %arg3[%c0_4, %c0_5] : memref<16x128xf32, #tpu.memory_space<vmem>>, vector<16x128xf32>
    %7 = arith.subf %6, %5 : vector<16x128xf32>
    %c0_6 = arith.constant 0 : index
    %c0_7 = arith.constant 0 : index
    %8 = vector.load %arg6[%c0_6, %c0_7] : memref<1x128xf32, #tpu.memory_space<vmem>>, vector<1x128xf32>
    %9 = vector.broadcast %8 : vector<1x128xf32> to vector<16x128xf32>
    %10 = arith.subf %7, %9 : vector<16x128xf32>
    %11 = arith.mulf %10, %10 : vector<16x128xf32>
    %cst_8 = arith.constant dense<0.000000e+00> : vector<128xf32>
    %12 = vector.multi_reduction <add>, %11, %cst_8 [0] : vector<16x128xf32> to vector<128xf32>
    %13 = vector.shape_cast %12 : vector<128xf32> to vector<1x128xf32>
    %c0_9 = arith.constant 0 : index
    %c0_10 = arith.constant 0 : index
    %c0_11 = arith.constant 0 : index
    %14 = vector.load %arg7[%c0_9, %c0_10, %c0_11] : memref<1x1x128xf32, #tpu.memory_space<vmem>>, vector<1x1x128xf32>
    %15 = vector.shape_cast %13 : vector<1x128xf32> to vector<1x1x128xf32>
    %16 = arith.addf %14, %15 : vector<1x1x128xf32>
    %c0_12 = arith.constant 0 : index
    %c0_13 = arith.constant 0 : index
    %c0_14 = arith.constant 0 : index
    %17 = vector.load %arg7[%c0_12, %c0_13, %c0_14] : memref<1x1x128xf32, #tpu.memory_space<vmem>>, vector<1x1x128xf32>
    tpu.vector_store %arg7[%c0_12, %c0_13, %c0_14], %16 {strides = array<i32>} : memref<1x1x128xf32, #tpu.memory_space<vmem>>, vector<1x1x128xf32>,
    return
  }
  func.func @transform_0(%arg0: i32, %arg1: i32, %arg2: i32) -> (i32, i32) {
    %c1_i32 = arith.constant 1 : i32
    %0 = arith.muli %arg0, %c1_i32 : i32
    %1 = arith.addi %0, %arg2 : i32
    %c0_i32 = arith.constant 0 : i32
    return %1, %arg1 : i32, i32
  }
  func.func @transform_1(%arg0: i32, %arg1: i32, %arg2: i32) -> (i32, i32) {
    %c1_i32 = arith.constant 1 : i32
    %0 = arith.muli %arg0, %c1_i32 : i32
    %1 = arith.addi %0, %arg2 : i32
    %c0_i32 = arith.constant 0 : i32
    %c0_i32_0 = arith.constant 0 : i32
    return %1, %c0_i32 : i32, i32
  }
  func.func @transform_2(%arg0: i32, %arg1: i32, %arg2: i32) -> (i32, i32) {
    %c0_i32 = arith.constant 0 : i32
    %c0_i32_0 = arith.constant 0 : i32
    return %c0_i32, %arg1 : i32, i32
  }
  func.func @transform_3(%arg0: i32, %arg1: i32, %arg2: i32) -> (i32, i32) {
    %c0_i32 = arith.constant 0 : i32
    %c0_i32_0 = arith.constant 0 : i32
    return %c0_i32, %arg1 : i32, i32
  }
  func.func @transform_4(%arg0: i32, %arg1: i32, %arg2: i32) -> (i32, i32, i32) {
    %c0_i32 = arith.constant 0 : i32
    %c0_i32_0 = arith.constant 0 : i32
    return %arg0, %c0_i32, %arg1 : i32, i32, i32
  }
}

</mosaic_0001>

<bundles_post_ra>
// kernel: hint_loss.1
= control target key start
LH: loop header
LB: loop body
LE: loop exit
PB: predicated region body
PF: predicated region fallthrough
CT: control target
= control target key end

     0   :  { %v255_v18 = vmov 0.0   ;;  %s353_s2 = inlined_call_operand.vmem [shape: f32[128,128], index: 2, kind: input, shape index: {}]   ;;  %s354_s1 = inlined_call_operand.vmem [shape: f32[16,128], index: 1, kind: input, shape index: {}]   ;;  %s355_s4 = inlined_call_operand.vmem [shape: f32[1,1,128], index: 4, kind: output, shape index: {}]   ;;  %s356_s0 = inlined_call_operand.vmem [shape: f32[16,128], index: 0, kind: input, shape index: {}]   ;;  %s357_s3 = inlined_call_operand.vmem [shape: f32[1,128], index: 3, kind: input, shape index: {}]  }
   0x1   :  { %v83_v0 = vld [vmem:[%s353_s2 + $0x78] sm:$0xff]  ;;  %v82_v1 = vld [vmem:[%s353_s2 + $0x70] sm:$0xff]  ;;  %v81_v2 = vld [vmem:[%s353_s2 + $0x68] sm:$0xff]  ;;  %65 = vst [vmem:[%s355_s4] sm:$0x1] %v255_v18 }
   0x2   :  { %219 = vmatprep.subr.mxu0 %v83_v0  ;;  %v80_v3 = vld [vmem:[%s353_s2 + $0x60] sm:$0xff]  ;;  %v79_v5 = vld [vmem:[%s353_s2 + $0x58] sm:$0xff]  ;;  %v78_v6 = vld [vmem:[%s353_s2 + $0x50] sm:$0xff] }
   0x3   :  { %220 = vmatpush3.msra.mxu0 %v83_v0  ;;  %v66_v4 = vld [vmem:[%s354_s1] sm:$0xff]  ;;  %v77_v7 = vld [vmem:[%s353_s2 + $0x48] sm:$0xff]  ;;  %v75_v9 = vld [vmem:[%s353_s2 + $0x38] sm:$0xff] }
   0x4   :  { %221 = vmatprep.subr.mxu0 %v82_v1  ;;  %251 = vmatprep.mubr.f32.mxu0 %v66_v4  ;;  %v76_v8 = vld [vmem:[%s353_s2 + $0x40] sm:$0xff]  ;;  %v74_v10 = vld [vmem:[%s353_s2 + $0x30] sm:$0xff]  ;;  %v73_v11 = vld [vmem:[%s353_s2 + $0x28] sm:$0xff] }
   0x5   :  { %222 = vmatpush3.msra.mxu0 %v82_v1  ;;  %v72_v12 = vld [vmem:[%s353_s2 + $0x20] sm:$0xff]  ;;  %v71_v13 = vld [vmem:[%s353_s2 + $0x18] sm:$0xff]  ;;  %v70_v14 = vld [vmem:[%s353_s2 + $0x10] sm:$0xff] }
   0x6   :  { %223 = vmatprep.subr.mxu0 %v81_v2  ;;  %v69_v15 = vld [vmem:[%s353_s2 + $0x8] sm:$0xff]  ;;  %v68_v16 = vld [vmem:[%s353_s2] sm:$0xff] }
   0x7   :  { %224 = vmatpush3.msra.mxu0 %v81_v2  ;;  %v67_v17 = vld [vmem:[%s354_s1 + $0x8] sm:$0xff]  ;;  %v200_v21 = vld [vmem:[%s357_s3] ss:$0 sm:$0xff] }
   0x8   :  { %225 = vmatprep.subr.mxu0 %v80_v3  ;;  %v160_v19 = vld [vmem:[%s356_s0 + $0x8] sm:$0xff]  ;;  %v159_v22 = vld [vmem:[%s356_s0] sm:$0xff] }
   0x9   :  { %226 = vmatpush3.msra.mxu0 %v80_v3  ;;  %v181_v36 = vld [vmem:[%s355_s4] sm:$0x1] }
   0xa   :  { %227 = vmatprep.subr.mxu0 %v79_v5 }
   0xb   :  { %228 = vmatpush3.msra.mxu0 %v79_v5 }
   0xc   :  { %229 = vmatprep.subr.mxu0 %v78_v6 }
   0xd   :  { %230 = vmatpush3.msra.mxu0 %v78_v6 }
   0xe   :  { %231 = vmatprep.subr.mxu0 %v77_v7 }
   0xf   :  { %232 = vmatpush3.msra.mxu0 %v77_v7 }
  0x10   :  { %233 = vmatprep.subr.mxu0 %v76_v8 }
  0x11   :  { %234 = vmatpush3.msra.mxu0 %v76_v8 }
  0x12   :  { %235 = vmatprep.subr.mxu0 %v75_v9 }
  0x13   :  { %236 = vmatpush3.msra.mxu0 %v75_v9 }
  0x14   :  { %237 = vmatprep.subr.mxu0 %v74_v10 }
  0x15   :  { %238 = vmatpush3.msra.mxu0 %v74_v10 }
  0x16   :  { %239 = vmatprep.subr.mxu0 %v73_v11 }
  0x17   :  { %240 = vmatpush3.msra.mxu0 %v73_v11 }
  0x18   :  { %241 = vmatprep.subr.mxu0 %v72_v12 }
  0x19   :  { %242 = vmatpush3.msra.mxu0 %v72_v12 }
  0x1a   :  { %243 = vmatprep.subr.mxu0 %v71_v13 }
  0x1b   :  { %244 = vmatpush3.msra.mxu0 %v71_v13 }
  0x1c   :  { %245 = vmatprep.subr.mxu0 %v70_v14 }
  0x1d   :  { %246 = vmatpush3.msra.mxu0 %v70_v14 }
  0x1e   :  { %247 = vmatprep.subr.mxu0 %v69_v15 }
  0x1f   :  { %248 = vmatpush3.msra.mxu0 %v69_v15 }
  0x20   :  { %249 = vmatprep.subr.mxu0 %v68_v16 }
  0x21   :  { %250 = vmatpush3.msra.mxu0 %v68_v16 }
  0x22   :  { %252 = vmatmul.mubr.f32.vlgmr.msra.gmra.mxu0 %v67_v17 }
  0xe2   :  { %v253_v20 = vpop.f32.mrf.mxu0 }
  0xe3   :  { %v162_v23 = vsub.f32 %v160_v19, %v253_v20 }
  0xe4   :  { %v150_v24 = vpop.f32.mrf.mxu0 }
  0xe5   :  { %v171_v25 = vsub.f32 %v162_v23, %v200_v21  ;;  %v161_v26 = vsub.f32 %v159_v22, %v150_v24 }
  0xe7   :  { %v170_v27 = vsub.f32 %v161_v26, %v200_v21  ;;  %v173_v28 = vmul.f32 %v171_v25, %v171_v25 }
  0xe9   :  { %v172_v29 = vmul.f32 %v170_v27, %v170_v27 }
  0xeb   :  { %v174_v30 = vadd.f32 %v173_v28, %v172_v29 }
  0xed   :  { %v175_v31 = vrot.slane %v174_v30, 4 }
  0xef   :  { %v176_v32 = vadd.f32 %v175_v31, %v174_v30 }
  0xf1   :  { %v177_v33 = vrot.slane %v176_v32, 2 }
  0xf3   :  { %v178_v34 = vadd.f32 %v177_v33, %v176_v32 }
  0xf5   :  { %v179_v35 = vrot.slane %v178_v34, 1 }
  0xf7   :  { %v180_v37 = vadd.f32 %v179_v35, %v178_v34 }
  0xf9   :  { %v182_v38 = vadd.f32 %v181_v36, %v180_v37 }
  0xfb   :  { %183 = vst [vmem:[%s355_s4] sm:$0x1] %v182_v38 }

</bundles_post_ra>
